<compile_context>
chip_gen: v6e
topology: v6e:2x2x1
jax: 0.10.0
libtpu: 0.0.40
codegen_flags: <defaults>
</compile_context>

<pallas_src>
import jax
import jax.numpy as jnp
from jax.experimental import pallas as pl
from jax.experimental.pallas import tpu as pltpu

# ----------------------------- model config ---------------------------------
B = 2            # batch size
N = 3            # images per sample
C = 4            # channels
H = W = 16       # spatial
PATCH = 4        # patch-embed conv kernel/stride
NPP = (H // PATCH) * (W // PATCH)     # patches per image = 16
D = C * PATCH * PATCH                 # im2col patch dim  = 64
CHW = C * H * W                       # pixel dim = 1024 (lane-dense contraction)
F = 32                                # backbone num_features (out_features)
K = 5                                 # num_classes (> 0 -> Linear head)
LANE = 128
OUT_W = 2 * LANE                      # fused output width: [features | logits]


# ------------------------------- kernel -------------------------------------
def _timm_fused_kernel(x_ref,      # (B, N, CHW)   f32  images, native pixel order
                       mask_ref,   # (B, N, 1)     f32  image validity mask
                       w_ref,      # (CHW, OUT_W)  f32  fused [W_feat | W_logit]
                       bias_ref,   # (B, OUT_W)    f32  per-sample n_valid * bias
                       out_ref):   # (B, OUT_W)    f32  [features | logits]
    x = x_ref[...]                                        # (B, N, CHW)
    mask = mask_ref[...]                                  # (B, N, 1)

    # masked sum over the image axis (commutes with the linear backbone/head)
    x_agg = jnp.sum(x * mask, axis=1)                     # (B, CHW)

    # single lane-dense MXU push: contraction 1024, output 256 wide
    out = jnp.dot(x_agg, w_ref[...],
                  preferred_element_type=jnp.float32)     # (B, OUT_W)
    out_ref[...] = (out + bias_ref[...]).astype(out_ref.dtype)


# --------------------------- one-time init path ------------------------------
def prepare_params(w_embed, w_head, b_head):
    """Fold mean-pool, pixel-order permutation, head fusion and lane padding
    into the weights ONCE (not on the per-call path).

    w_embed: (D, F)  patch-embed weight (im2col row order: c, ph, pw)
    w_head : (F, K)  head Linear weight
    b_head : (1, K)  head Linear bias
    Returns (w_comb (CHW, 256) f32, bias256 (1, 256) f32).
    """
    w_embed = w_embed.astype(jnp.float32)
    w_head = w_head.astype(jnp.float32)
    b_head = b_head.astype(jnp.float32)

    # Map each native pixel (c, y, x) to its im2col row (c, y%P, x%P) and fold
    # in the 1/NPP mean over patches -> contraction over the full pixel axis.
    c_idx = jnp.arange(C, dtype=jnp.int32)[:, None, None]
    y_idx = (jnp.arange(H, dtype=jnp.int32) % PATCH)[None, :, None]
    x_idx = (jnp.arange(W, dtype=jnp.int32) % PATCH)[None, None, :]
    d_idx = (c_idx * PATCH * PATCH + y_idx * PATCH + x_idx).reshape(-1)  # (CHW,)

    w_pix = w_embed[d_idx, :] / float(NPP)                 # (CHW, F)  feature path
    w_logit = w_pix @ w_head                               # (CHW, K)  fused logit path

    w_comb = jnp.zeros((CHW, OUT_W), jnp.float32)
    w_comb = w_comb.at[:, :F].set(w_pix)
    w_comb = w_comb.at[:, LANE:LANE + K].set(w_logit)

    bias256 = jnp.zeros((1, OUT_W), jnp.float32)
    bias256 = bias256.at[:, LANE:LANE + K].set(b_head.reshape(1, K))
    return w_comb, bias256


# ------------------------------ forward path ---------------------------------
@jax.jit
def timm_image_forward(images, image_valid_num, w_comb, bias256):
    """images: (B, N, C, H, W) f32; image_valid_num: (B,) int32."""
    b, n, c, h, w = images.shape
    chw = c * h * w

    # Native layout kept; this reshape is contiguous (no transpose, no HBM copy).
    x = images.reshape(b, n, chw).astype(jnp.float32)

    # Mask / effective bias built wrapper-side (fused by XLA under jit).
    steps = jnp.arange(n, dtype=jnp.int32)
    mask = (steps[None, :] < image_valid_num.astype(jnp.int32)[:, None]).astype(jnp.float32)
    n_valid = jnp.sum(mask, axis=1, keepdims=True)          # (B, 1)
    bias_eff = n_valid * bias256                             # (B, OUT_W): n_valid * b
    mask = mask[:, :, None]                                  # (B, N, 1)

    out = pl.pallas_call(
        _timm_fused_kernel,
        out_shape=jax.ShapeDtypeStruct((b, OUT_W), jnp.float32),
        grid=(1,),                                           # single step, single TC
        in_specs=[
            pl.BlockSpec((b, n, chw), lambda i: (0, 0, 0)),
            pl.BlockSpec((b, n, 1), lambda i: (0, 0, 0)),
            pl.BlockSpec((chw, OUT_W), lambda i: (0, 0)),
            pl.BlockSpec((b, OUT_W), lambda i: (0, 0)),
        ],
        out_specs=pl.BlockSpec((b, OUT_W), lambda i: (0, 0)),
        compiler_params=pltpu.CompilerParams(
            dimension_semantics=("arbitrary",)),
    )(x, mask, w_comb, bias_eff)

    features = out[:, :F]                                    # cols [0, F)
    logits = out[:, LANE:LANE + K]                           # cols [128, 128+K)

    # Mirrors: return {prefix: {LOGITS: logits, FEATURES: features}}
    return {"timm_image": {"logits": logits, "features": features}}


# ------------------------- pure-JAX reference --------------------------------
def reference_forward(images, image_valid_num, w_embed, w_head, b_head):
    b, n, c, h, w = images.shape
    p = PATCH
    npp = (h // p) * (w // p)
    d = c * p * p
    patches = images.reshape(b, n, c, h // p, p, w // p, p)
    patches = patches.transpose(0, 1, 3, 5, 2, 4, 6).reshape(b * n, npp, d)
    feats = jnp.mean(patches @ w_embed, axis=1)                        # (B*N, F)
    logits = feats @ w_head + b_head[0]                                # (B*N, K)
    steps = jnp.arange(n)
    masks = (steps[None, :] < image_valid_num[:, None]).astype(jnp.float32)
    feats = (feats.reshape(b, n, -1) * masks[:, :, None]).sum(axis=1)
    logits = (logits.reshape(b, n, -1) * masks[:, :, None]).sum(axis=1)
    return feats, logits


if __name__ == "__main__":
    key = jax.random.PRNGKey(0)
    k_img, k_emb, k_head, k_bias = jax.random.split(key, 4)

    images = jax.random.normal(k_img, (B, N, C, H, W), dtype=jnp.float32)
    image_valid_num = jnp.array([2, 3], dtype=jnp.int32)   # valid images per sample

    # Deterministic synthetic parameters (shapes implied by __init__):
    # backbone patch-embed weight (D, F); head Linear (F, K) + bias (1, K)
    w_embed = 0.02 * jax.random.normal(k_emb, (D, F), dtype=jnp.float32)
    w_head = 0.02 * jax.random.normal(k_head, (F, K), dtype=jnp.float32)
    b_head = 0.1 * jax.random.normal(k_bias, (1, K), dtype=jnp.float32)

    # One-time weight fusion/padding (init path, not per call).
    w_comb, bias256 = prepare_params(w_embed, w_head, b_head)

    out = timm_image_forward(images, image_valid_num, w_comb, bias256)
    logits = jax.block_until_ready(out["timm_image"]["logits"])
    features = jax.block_until_ready(out["timm_image"]["features"])

    ref_feats, ref_logits = reference_forward(images, image_valid_num,
                                              w_embed, w_head, b_head)
    assert features.shape == (B, F) and logits.shape == (B, K)
    assert jnp.allclose(features, ref_feats, rtol=1e-4, atol=1e-4)
    assert jnp.allclose(logits, ref_logits, rtol=1e-4, atol=1e-4)

    print("KERNEL_OK")
</pallas_src>

<mosaic_0001>
module attributes {stable_mosaic.version = 11 : i64} {
  func.func @_timm_fused_kernel(%arg0: i32, %arg1: memref<2x3x1024xf32, #tpu.memory_space<vmem>>, %arg2: memref<2x3x1xf32, #tpu.memory_space<vmem>>, %arg3: memref<1024x256xf32, #tpu.memory_space<vmem>>, %arg4: memref<2x256xf32, #tpu.memory_space<vmem>>, %arg5: memref<2x256xf32, #tpu.memory_space<vmem>>) attributes {dimension_semantics = [#tpu.dimension_semantics<arbitrary>], iteration_bounds = array<i64: 1>, scalar_prefetch = 0 : i64, scratch_operands = 0 : i64, tpu.core_type = #tpu.core_type<tc>, window_params = [{pipeline_mode = #tpu.pipeline_mode<synchronous>, transform_indices = @transform_0, window_bounds = array<i64: 2, 3, 1024>}, {pipeline_mode = #tpu.pipeline_mode<synchronous>, transform_indices = @transform_1, window_bounds = array<i64: 2, 3, 1>}, {pipeline_mode = #tpu.pipeline_mode<synchronous>, transform_indices = @transform_2, window_bounds = array<i64: 1024, 256>}, {pipeline_mode = #tpu.pipeline_mode<synchronous>, transform_indices = @transform_3, window_bounds = array<i64: 2, 256>}, {pipeline_mode = #tpu.pipeline_mode<synchronous>, transform_indices = @transform_4, window_bounds = array<i64: 2, 256>}]} {
    %c0 = arith.constant 0 : index
    %c0_0 = arith.constant 0 : index
    %c0_1 = arith.constant 0 : index
    %0 = vector.load %arg1[%c0, %c0_0, %c0_1] : memref<2x3x1024xf32, #tpu.memory_space<vmem>>, vector<2x3x1024xf32>
    %c0_2 = arith.constant 0 : index
    %c0_3 = arith.constant 0 : index
    %c0_4 = arith.constant 0 : index
    %1 = vector.load %arg2[%c0_2, %c0_3, %c0_4] : memref<2x3x1xf32, #tpu.memory_space<vmem>>, vector<2x3x1xf32>
    %2 = vector.broadcast %1 : vector<2x3x1xf32> to vector<2x3x1024xf32>
    %3 = arith.mulf %0, %2 : vector<2x3x1024xf32>
    %cst = arith.constant dense<0.000000e+00> : vector<2x1024xf32>
    %4 = vector.multi_reduction <add>, %3, %cst [1] : vector<2x3x1024xf32> to vector<2x1024xf32>
    %c0_5 = arith.constant 0 : index
    %c0_6 = arith.constant 0 : index
    %5 = vector.load %arg3[%c0_5, %c0_6] : memref<1024x256xf32, #tpu.memory_space<vmem>>, vector<1024x256xf32>
    %cst_7 = arith.constant dense<0.000000e+00> : vector<2x256xf32>
    %6 = tpu.matmul %4, %5, %cst_7 {dimension_numbers = #tpu.dot_dimension_numbers<[1], [0], [0], [1], [0, 0, 1, 1], [], []>} : vector<2x1024xf32>, vector<1024x256xf32>, vector<2x256xf32> -> vector<2x256xf32>
    %c0_8 = arith.constant 0 : index
    %c0_9 = arith.constant 0 : index
    %7 = vector.load %arg4[%c0_8, %c0_9] : memref<2x256xf32, #tpu.memory_space<vmem>>, vector<2x256xf32>
    %8 = arith.addf %6, %7 : vector<2x256xf32>
    %c0_10 = arith.constant 0 : index
    %c0_11 = arith.constant 0 : index
    %9 = vector.load %arg5[%c0_10, %c0_11] : memref<2x256xf32, #tpu.memory_space<vmem>>, vector<2x256xf32>
    tpu.vector_store %arg5[%c0_10, %c0_11], %8 {strides = array<i32>} : memref<2x256xf32, #tpu.memory_space<vmem>>, vector<2x256xf32>,
    return
  }
  func.func @transform_0(%arg0: i32) -> (i32, i32, i32) {
    %c0_i32 = arith.constant 0 : i32
    %c0_i32_0 = arith.constant 0 : i32
    %c0_i32_1 = arith.constant 0 : i32
    %c0_i32_2 = arith.constant 0 : i32
    return %c0_i32, %c0_i32_0, %c0_i32_1 : i32, i32, i32
  }
  func.func @transform_1(%arg0: i32) -> (i32, i32, i32) {
    %c0_i32 = arith.constant 0 : i32
    %c0_i32_0 = arith.constant 0 : i32
    %c0_i32_1 = arith.constant 0 : i32
    %c0_i32_2 = arith.constant 0 : i32
    return %c0_i32, %c0_i32_0, %c0_i32_1 : i32, i32, i32
  }
  func.func @transform_2(%arg0: i32) -> (i32, i32) {
    %c0_i32 = arith.constant 0 : i32
    %c0_i32_0 = arith.constant 0 : i32
    %c0_i32_1 = arith.constant 0 : i32
    return %c0_i32, %c0_i32_0 : i32, i32
  }
  func.func @transform_3(%arg0: i32) -> (i32, i32) {
    %c0_i32 = arith.constant 0 : i32
    %c0_i32_0 = arith.constant 0 : i32
    %c0_i32_1 = arith.constant 0 : i32
    return %c0_i32, %c0_i32_0 : i32, i32
  }
  func.func @transform_4(%arg0: i32) -> (i32, i32) {
    %c0_i32 = arith.constant 0 : i32
    %c0_i32_0 = arith.constant 0 : i32
    %c0_i32_1 = arith.constant 0 : i32
    return %c0_i32, %c0_i32_0 : i32, i32
  }
}

</mosaic_0001>

<bundles_post_ra>
// kernel: timm_image_forward.1
= control target key start
LH: loop header
LB: loop body
LE: loop exit
PB: predicated region body
PF: predicated region fallthrough
CT: control target
= control target key end

     0   :  { %9 = vsyncpa [#allocation3], 0  ;;  %s842_s15 = smov [#allocation2]   ;;  %s974_s0 = inlined_call_operand.vmem [shape: f32[2,3,1024], index: 0, kind: input, shape index: {}]   ;;  %s975_s1 = inlined_call_operand.vmem [shape: f32[2,3,1], index: 1, kind: input, shape index: {}]   ;;  %s976_s2 = inlined_call_operand.hbm [shape: f32[1024,256], index: 2, kind: input, shape index: {}]   ;;  %s977_s3 = inlined_call_operand.vmem [shape: f32[2,256], index: 3, kind: input, shape index: {}]   ;;  %s978_s4 = inlined_call_operand.vmem [shape: f32[2,256], index: 4, kind: output, shape index: {}]  }
   0x1   :  { %s19_s16 = sshll.u32 %s842_s15, 4  ;;  %s20_s16 = int_to_ptr.vmem [resolvable:$true] %s19_s16 }
   0x2   :  { %s828_s17 = scalar_lea.vmem %s20_s16, 32768  ;;  %p833_p1 = scmp.lt.s32.totalorder %s20_s16, %s20_s16 }
   0x3   :  { %p829_p0 = scmp.ne.s32.totalorder %s20_s16, %s828_s17  ;;  %p834_p2 = scmp.lt.s32.totalorder %s828_s17, %s828_s17 }
   0x5   :  { %p835_p3 = por %p834_p2, %p833_p1 }
   0x7   :  { %p836_p4 = pnand %p835_p3, %p829_p0 }
   0x9   :  { %839 = shalt.err (!%p836_p4)
}
   0xa   :  { %s843_s18 = smov 256   ;;  %s844_s19 = smov 16  }
   0xb   :  { %25 = dma.hbm_to_vmem [thread:$0]  %s976_s2, 32768, %s20_s16, [#allocation3], %s843_s18, %s843_s18, %s844_s19  }
   0xc   :  { %840 = dma.done.wait [#allocation3], 32768  }
   0xd   :  { %841 = vsyncadd [#allocation3], 4294934528  ;;  %v845_v0 = vmov 0   ;;  %v39_v1 = vld [vmem:[%s975_s1] sm:$0x7]  ;;  %v241_v3 = vld [vmem:[#allocation2 + $0xf8] sm:$0xff] }
   0xe   :  { %819 = vset.pattern.permute.xlu0 %v845_v0  ;;  %v40_v2 = vld [vmem:[%s975_s1 + $0x4] sm:$0x7]  ;;  %511 = vmatprep.subr.mxu0 %v241_v3  ;;  %v305_v4 = vld [vmem:[#allocation2 + $0x2f8] sm:$0xff]  ;;  %v240_v5 = vld [vmem:[#allocation2 + $0xf0] sm:$0xff]  ;;  %vm97_vm0 = vcmask 1042432   ;;  %vm483_vm1 = vcmask 1041409  }
   0xf   :  { %43 = vperm.xlu0 %819, %v39_v1   ;;  %v304_v6 = vld [vmem:[#allocation2 + $0x2f0] sm:$0xff]  ;;  %582 = vmatprep.subr.mxu1 %v305_v4  ;;  %v239_v7 = vld [vmem:[#allocation2 + $0xe8] sm:$0xff]  ;;  %v238_v9 = vld [vmem:[#allocation2 + $0xe0] sm:$0xff] }
  0x10   :  { %512 = vmatpush1.msra.mxu0 %v240_v5  ;;  %v303_v8 = vld [vmem:[#allocation2 + $0x2e8] sm:$0xff]  ;;  %583 = vmatpush1.msra.mxu1 %v304_v6  ;;  %v302_v10 = vld [vmem:[#allocation2 + $0x2e0] sm:$0xff]  ;;  %v237_v11 = vld [vmem:[#allocation2 + $0xd8] sm:$0xff] }
  0x11   :  { %513 = vmatprep.subr.mxu0 %v239_v7  ;;  %v301_v12 = vld [vmem:[#allocation2 + $0x2d8] sm:$0xff]  ;;  %584 = vmatprep.subr.mxu1 %v303_v8  ;;  %v236_v13 = vld [vmem:[#allocation2 + $0xd0] sm:$0xff]  ;;  %v235_v15 = vld [vmem:[#allocation2 + $0xc8] sm:$0xff] }
  0x12   :  { %514 = vmatpush1.msra.mxu0 %v238_v9  ;;  %v300_v14 = vld [vmem:[#allocation2 + $0x2d0] sm:$0xff]  ;;  %585 = vmatpush1.msra.mxu1 %v302_v10  ;;  %v299_v16 = vld [vmem:[#allocation2 + $0x2c8] sm:$0xff]  ;;  %v234_v17 = vld [vmem:[#allocation2 + $0xc0] sm:$0xff] }
  0x13   :  { %47 = vperm.xlu0 %819, %v40_v2   ;;  %515 = vmatprep.subr.mxu0 %v237_v11  ;;  %v298_v18 = vld [vmem:[#allocation2 + $0x2c0] sm:$0xff]  ;;  %v233_v19 = vld [vmem:[#allocation2 + $0xb8] sm:$0xff]  ;;  %v232_v21 = vld [vmem:[#allocation2 + $0xb0] sm:$0xff] }
  0x14   :  { %586 = vmatprep.subr.mxu1 %v301_v12  ;;  %516 = vmatpush1.msra.mxu0 %v236_v13  ;;  %v297_v20 = vld [vmem:[#allocation2 + $0x2b8] sm:$0xff]  ;;  %v296_v22 = vld [vmem:[#allocation2 + $0x2b0] sm:$0xff]  ;;  %v231_v23 = vld [vmem:[#allocation2 + $0xa8] sm:$0xff] }
  0x15   :  { %587 = vmatpush1.msra.mxu1 %v300_v14  ;;  %517 = vmatprep.subr.mxu0 %v235_v15  ;;  %v295_v24 = vld [vmem:[#allocation2 + $0x2a8] sm:$0xff]  ;;  %v230_v25 = vld [vmem:[#allocation2 + $0xa0] sm:$0xff]  ;;  %v229_v27 = vld [vmem:[#allocation2 + $0x98] sm:$0xff] }
  0x16   :  { %588 = vmatprep.subr.mxu1 %v299_v16  ;;  %518 = vmatpush1.msra.mxu0 %v234_v17  ;;  %v294_v26 = vld [vmem:[#allocation2 + $0x2a0] sm:$0xff]  ;;  %v293_v28 = vld [vmem:[#allocation2 + $0x298] sm:$0xff]  ;;  %v228_v29 = vld [vmem:[#allocation2 + $0x90] sm:$0xff] }
  0x17   :  { %589 = vmatpush1.msra.mxu1 %v298_v18  ;;  %519 = vmatprep.subr.mxu0 %v233_v19  ;;  %v292_v30 = vld [vmem:[#allocation2 + $0x290] sm:$0xff]  ;;  %v227_v31 = vld [vmem:[#allocation2 + $0x88] sm:$0xff]  ;;  %v226_v33 = vld [vmem:[#allocation2 + $0x80] sm:$0xff] }
  0x18   :  { %590 = vmatprep.subr.mxu1 %v297_v20  ;;  %520 = vmatpush1.msra.mxu0 %v232_v21  ;;  %v291_v32 = vld [vmem:[#allocation2 + $0x288] sm:$0xff]  ;;  %v290_v34 = vld [vmem:[#allocation2 + $0x280] sm:$0xff]  ;;  %v225_v35 = vld [vmem:[#allocation2 + $0x78] sm:$0xff] }
  0x19   :  { %591 = vmatpush1.msra.mxu1 %v296_v22  ;;  %521 = vmatprep.subr.mxu0 %v231_v23  ;;  %v289_v36 = vld [vmem:[#allocation2 + $0x278] sm:$0xff]  ;;  %v224_v37 = vld [vmem:[#allocation2 + $0x70] sm:$0xff]  ;;  %v223_v39 = vld [vmem:[#allocation2 + $0x68] sm:$0xff] }
  0x1a   :  { %592 = vmatprep.subr.mxu1 %v295_v24  ;;  %522 = vmatpush1.msra.mxu0 %v230_v25  ;;  %v288_v38 = vld [vmem:[#allocation2 + $0x270] sm:$0xff]  ;;  %v287_v40 = vld [vmem:[#allocation2 + $0x268] sm:$0xff]  ;;  %v222_v41 = vld [vmem:[#allocation2 + $0x60] sm:$0xff] }
  0x1b   :  { %593 = vmatpush1.msra.mxu1 %v294_v26  ;;  %523 = vmatprep.subr.mxu0 %v229_v27  ;;  %v286_v42 = vld [vmem:[#allocation2 + $0x260] sm:$0xff]  ;;  %v221_v43 = vld [vmem:[#allocation2 + $0x58] sm:$0xff]  ;;  %v220_v45 = vld [vmem:[#allocation2 + $0x50] sm:$0xff] }
  0x1c   :  { %594 = vmatprep.subr.mxu1 %v293_v28  ;;  %524 = vmatpush1.msra.mxu0 %v228_v29  ;;  %v285_v44 = vld [vmem:[#allocation2 + $0x258] sm:$0xff]  ;;  %v284_v46 = vld [vmem:[#allocation2 + $0x250] sm:$0xff]  ;;  %v219_v47 = vld [vmem:[#allocation2 + $0x48] sm:$0xff] }
  0x1d   :  { %595 = vmatpush1.msra.mxu1 %v292_v30  ;;  %525 = vmatprep.subr.mxu0 %v227_v31  ;;  %v283_v48 = vld [vmem:[#allocation2 + $0x248] sm:$0xff]  ;;  %v218_v49 = vld [vmem:[#allocation2 + $0x40] sm:$0xff]  ;;  %v217_v51 = vld [vmem:[#allocation2 + $0x38] sm:$0xff] }
  0x1e   :  { %596 = vmatprep.subr.mxu1 %v291_v32  ;;  %526 = vmatpush1.msra.mxu0 %v226_v33  ;;  %v282_v50 = vld [vmem:[#allocation2 + $0x240] sm:$0xff]  ;;  %v281_v52 = vld [vmem:[#allocation2 + $0x238] sm:$0xff]  ;;  %v216_v53 = vld [vmem:[#allocation2 + $0x30] sm:$0xff] }
  0x1f   :  { %597 = vmatpush1.msra.mxu1 %v290_v34  ;;  %527 = vmatprep.subr.mxu0 %v225_v35  ;;  %v280_v54 = vld [vmem:[#allocation2 + $0x230] sm:$0xff]  ;;  %v215_v55 = vld [vmem:[#allocation2 + $0x28] sm:$0xff]  ;;  %v214_v57 = vld [vmem:[#allocation2 + $0x20] sm:$0xff] }
  0x20   :  { %598 = vmatprep.subr.mxu1 %v289_v36  ;;  %528 = vmatpush1.msra.mxu0 %v224_v37  ;;  %v279_v56 = vld [vmem:[#allocation2 + $0x228] sm:$0xff]  ;;  %v278_v58 = vld [vmem:[#allocation2 + $0x220] sm:$0xff]  ;;  %v213_v59 = vld [vmem:[#allocation2 + $0x18] sm:$0xff] }
  0x21   :  { %599 = vmatpush1.msra.mxu1 %v288_v38  ;;  %529 = vmatprep.subr.mxu0 %v223_v39  ;;  %v277_v60 = vld [vmem:[#allocation2 + $0x218] sm:$0xff]  ;;  %v212_v61 = vld [vmem:[#allocation2 + $0x10] sm:$0xff]  ;;  %v211_v63 = vld [vmem:[#allocation2 + $0x8] sm:$0xff] }
  0x22   :  { %600 = vmatprep.subr.mxu1 %v287_v40  ;;  %530 = vmatpush1.msra.mxu0 %v222_v41  ;;  %v276_v62 = vld [vmem:[#allocation2 + $0x210] sm:$0xff]  ;;  %v275_v0 = vld [vmem:[#allocation2 + $0x208] sm:$0xff]  ;;  %v210_v1 = vld [vmem:[#allocation2] sm:$0xff] }
  0x23   :  { %601 = vmatpush1.msra.mxu1 %v286_v42  ;;  %531 = vmatprep.subr.mxu0 %v221_v43  ;;  %v274_v2 = vld [vmem:[#allocation2 + $0x200] sm:$0xff]  ;;  %v273_v3 = vld [vmem:[#allocation2 + $0x1f8] sm:$0xff]  ;;  %v272_v5 = vld [vmem:[#allocation2 + $0x1f0] sm:$0xff] }
  0x24   :  { %602 = vmatprep.subr.mxu1 %v285_v44  ;;  %532 = vmatpush1.msra.mxu0 %v220_v45  ;;  %v337_v4 = vld [vmem:[#allocation2 + $0x3f8] sm:$0xff]  ;;  %v336_v6 = vld [vmem:[#allocation2 + $0x3f0] sm:$0xff]  ;;  %v271_v7 = vld [vmem:[#allocation2 + $0x1e8] sm:$0xff] }
  0x25   :  { %603 = vmatpush1.msra.mxu1 %v284_v46  ;;  %533 = vmatprep.subr.mxu0 %v219_v47  ;;  %v335_v8 = vld [vmem:[#allocation2 + $0x3e8] sm:$0xff]  ;;  %v270_v9 = vld [vmem:[#allocation2 + $0x1e0] sm:$0xff]  ;;  %v269_v11 = vld [vmem:[#allocation2 + $0x1d8] sm:$0xff] }
  0x26   :  { %604 = vmatprep.subr.mxu1 %v283_v48  ;;  %534 = vmatpush1.msra.mxu0 %v218_v49  ;;  %v334_v10 = vld [vmem:[#allocation2 + $0x3e0] sm:$0xff]  ;;  %v333_v12 = vld [vmem:[#allocation2 + $0x3d8] sm:$0xff]  ;;  %v268_v13 = vld [vmem:[#allocation2 + $0x1d0] sm:$0xff] }
  0x27   :  { %605 = vmatpush1.msra.mxu1 %v282_v50  ;;  %535 = vmatprep.subr.mxu0 %v217_v51  ;;  %v332_v14 = vld [vmem:[#allocation2 + $0x3d0] sm:$0xff]  ;;  %v267_v15 = vld [vmem:[#allocation2 + $0x1c8] sm:$0xff]  ;;  %v266_v17 = vld [vmem:[#allocation2 + $0x1c0] sm:$0xff] }
  0x28   :  { %606 = vmatprep.subr.mxu1 %v281_v52  ;;  %536 = vmatpush1.msra.mxu0 %v216_v53  ;;  %v331_v16 = vld [vmem:[#allocation2 + $0x3c8] sm:$0xff]  ;;  %v330_v18 = vld [vmem:[#allocation2 + $0x3c0] sm:$0xff]  ;;  %v265_v19 = vld [vmem:[#allocation2 + $0x1b8] sm:$0xff] }
  0x29   :  { %607 = vmatpush1.msra.mxu1 %v280_v54  ;;  %537 = vmatprep.subr.mxu0 %v215_v55  ;;  %v329_v20 = vld [vmem:[#allocation2 + $0x3b8] sm:$0xff]  ;;  %v264_v21 = vld [vmem:[#allocation2 + $0x1b0] sm:$0xff]  ;;  %v263_v23 = vld [vmem:[#allocation2 + $0x1a8] sm:$0xff] }
  0x2a   :  { %608 = vmatprep.subr.mxu1 %v279_v56  ;;  %538 = vmatpush1.msra.mxu0 %v214_v57  ;;  %v328_v22 = vld [vmem:[#allocation2 + $0x3b0] sm:$0xff]  ;;  %v327_v24 = vld [vmem:[#allocation2 + $0x3a8] sm:$0xff]  ;;  %v262_v25 = vld [vmem:[#allocation2 + $0x1a0] sm:$0xff] }
  0x2b   :  { %609 = vmatpush1.msra.mxu1 %v278_v58  ;;  %539 = vmatprep.subr.mxu0 %v213_v59  ;;  %v326_v26 = vld [vmem:[#allocation2 + $0x3a0] sm:$0xff]  ;;  %v261_v27 = vld [vmem:[#allocation2 + $0x198] sm:$0xff]  ;;  %v260_v29 = vld [vmem:[#allocation2 + $0x190] sm:$0xff] }
  0x2c   :  { %610 = vmatprep.subr.mxu1 %v277_v60  ;;  %540 = vmatpush1.msra.mxu0 %v212_v61  ;;  %v325_v28 = vld [vmem:[#allocation2 + $0x398] sm:$0xff]  ;;  %v324_v30 = vld [vmem:[#allocation2 + $0x390] sm:$0xff]  ;;  %v259_v31 = vld [vmem:[#allocation2 + $0x188] sm:$0xff] }
  0x2d   :  { %611 = vmatpush1.msra.mxu1 %v276_v62  ;;  %541 = vmatprep.subr.mxu0 %v211_v63  ;;  %v323_v32 = vld [vmem:[#allocation2 + $0x388] sm:$0xff]  ;;  %v258_v33 = vld [vmem:[#allocation2 + $0x180] sm:$0xff]  ;;  %v257_v35 = vld [vmem:[#allocation2 + $0x178] sm:$0xff] }
  0x2e   :  { %612 = vmatprep.subr.mxu1 %v275_v0  ;;  %542 = vmatpush1.msra.mxu0 %v210_v1  ;;  %v322_v34 = vld [vmem:[#allocation2 + $0x380] sm:$0xff]  ;;  %v321_v36 = vld [vmem:[#allocation2 + $0x378] sm:$0xff]  ;;  %v256_v37 = vld [vmem:[#allocation2 + $0x170] sm:$0xff] }
  0x2f   :  { %613 = vmatpush1.msra.mxu1 %v274_v2  ;;  %543 = vmatprep.subr.mxu0 %v273_v3  ;;  %v320_v38 = vld [vmem:[#allocation2 + $0x370] sm:$0xff]  ;;  %v255_v39 = vld [vmem:[#allocation2 + $0x168] sm:$0xff]  ;;  %v254_v41 = vld [vmem:[#allocation2 + $0x160] sm:$0xff] }
  0x30   :  { %614 = vmatprep.subr.mxu1 %v337_v4  ;;  %544 = vmatpush2.msra.mxu0 %v272_v5  ;;  %v319_v40 = vld [vmem:[#allocation2 + $0x368] sm:$0xff]  ;;  %v318_v42 = vld [vmem:[#allocation2 + $0x360] sm:$0xff]  ;;  %v253_v43 = vld [vmem:[#allocation2 + $0x158] sm:$0xff]  ;;  %v846_v5 = vmov 839922192  }
  0x31   :  { %615 = vmatpush2.msra.mxu1 %v336_v6  ;;  %545 = vmatprep.subr.mxu0 %v271_v7  ;;  %v317_v44 = vld [vmem:[#allocation2 + $0x358] sm:$0xff]  ;;  %v252_v45 = vld [vmem:[#allocation2 + $0x150] sm:$0xff]  ;;  %v251_v47 = vld [vmem:[#allocation2 + $0x148] sm:$0xff]  ;;  %v50_v6 = vunpack.c.l.s4 %v846_v5  ;;  %v52_v7 = vlaneseq }
  0x32   :  { %616 = vmatprep.subr.mxu1 %v335_v8  ;;  %546 = vmatpush2.msra.mxu0 %v270_v9  ;;  %v316_v46 = vld [vmem:[#allocation2 + $0x350] sm:$0xff]  ;;  %v315_v48 = vld [vmem:[#allocation2 + $0x348] sm:$0xff]  ;;  %v250_v49 = vld [vmem:[#allocation2 + $0x140] sm:$0xff] }
  0x33   :  { %617 = vmatpush2.msra.mxu1 %v334_v10  ;;  %547 = vmatprep.subr.mxu0 %v269_v11  ;;  %v314_v50 = vld [vmem:[#allocation2 + $0x340] sm:$0xff]  ;;  %v249_v51 = vld [vmem:[#allocation2 + $0x138] sm:$0xff]  ;;  %v248_v53 = vld [vmem:[#allocation2 + $0x130] sm:$0xff]  ;;  %v51_v8 = vunpack.c.0.s8 %v50_v6  ;;  %v53_v9 = vshrl.u32 %v52_v7, 7 }
  0x34   :  { %618 = vmatprep.subr.mxu1 %v333_v12  ;;  %548 = vmatpush2.msra.mxu0 %v268_v13  ;;  %v313_v52 = vld [vmem:[#allocation2 + $0x338] sm:$0xff]  ;;  %v312_v54 = vld [vmem:[#allocation2 + $0x330] sm:$0xff]  ;;  %v247_v55 = vld [vmem:[#allocation2 + $0x128] sm:$0xff] }
  0x35   :  { %619 = vmatpush2.msra.mxu1 %v332_v14  ;;  %549 = vmatprep.subr.mxu0 %v267_v15  ;;  %v311_v56 = vld [vmem:[#allocation2 + $0x328] sm:$0xff]  ;;  %v246_v57 = vld [vmem:[#allocation2 + $0x120] sm:$0xff]  ;;  %v245_v59 = vld [vmem:[#allocation2 + $0x118] sm:$0xff]  ;;  %v54_v10 = vsub.s32 %v51_v8, %v53_v9 }
  0x36   :  { %620 = vmatprep.subr.mxu1 %v331_v16  ;;  %550 = vmatpush2.msra.mxu0 %v266_v17  ;;  %v310_v58 = vld [vmem:[#allocation2 + $0x320] sm:$0xff]  ;;  %v309_v60 = vld [vmem:[#allocation2 + $0x318] sm:$0xff]  ;;  %v244_v61 = vld [vmem:[#allocation2 + $0x110] sm:$0xff] }
  0x37   :  { %621 = vmatpush2.msra.mxu1 %v330_v18  ;;  %551 = vmatprep.subr.mxu0 %v265_v19  ;;  %v308_v62 = vld [vmem:[#allocation2 + $0x310] sm:$0xff]  ;;  %v243_v63 = vld [vmem:[#allocation2 + $0x108] sm:$0xff]  ;;  %v242_v1 = vld [vmem:[#allocation2 + $0x100] sm:$0xff] }
  0x38   :  { %622 = vmatprep.subr.mxu1 %v329_v20  ;;  %552 = vmatpush2.msra.mxu0 %v264_v21  ;;  %v307_v0 = vld [vmem:[#allocation2 + $0x308] sm:$0xff]  ;;  %v306_v2 = vld [vmem:[#allocation2 + $0x300] sm:$0xff]  ;;  %v369_v3 = vld [vmem:[#allocation2 + $0x4f8] sm:$0xff] }
  0x39   :  { %623 = vmatpush2.msra.mxu1 %v328_v22  ;;  %553 = vmatprep.subr.mxu0 %v263_v23  ;;  %v433_v4 = vld [vmem:[#allocation2 + $0x6f8] sm:$0xff]  ;;  %v31_v11 = vld [vmem:[%s974_s0] sm:$0x77]  ;;  %v32_v13 = vld [vmem:[%s974_s0 + $0x8] sm:$0x77] }
  0x3a   :  { %624 = vmatprep.subr.mxu1 %v327_v24  ;;  %554 = vmatpush2.msra.mxu0 %v262_v25  ;;  %v33_v14 = vld [vmem:[%s974_s0 + $0x10] sm:$0x77]  ;;  %v34_v15 = vld [vmem:[%s974_s0 + $0x18] sm:$0x77] }
  0x3b   :  { %625 = vmatpush2.msra.mxu1 %v326_v26  ;;  %555 = vmatprep.subr.mxu0 %v261_v27  ;;  %v35_v26 = vld [vmem:[%s974_s0 + $0x20] sm:$0x77]  ;;  %v36_v27 = vld [vmem:[%s974_s0 + $0x28] sm:$0x77] }
  0x3c   :  { %626 = vmatprep.subr.mxu1 %v325_v28  ;;  %556 = vmatpush2.msra.mxu0 %v260_v29 }
  0x3d   :  { %627 = vmatpush2.msra.mxu1 %v324_v30  ;;  %557 = vmatprep.subr.mxu0 %v259_v31 }
  0x3e   :  { %628 = vmatprep.subr.mxu1 %v323_v32  ;;  %558 = vmatpush2.msra.mxu0 %v258_v33  ;;  %v37_v32 = vld [vmem:[%s974_s0 + $0x30] sm:$0x77] }
  0x3f   :  { %629 = vmatpush2.msra.mxu1 %v322_v34  ;;  %559 = vmatprep.subr.mxu0 %v257_v35 }
  0x40   :  { %630 = vmatprep.subr.mxu1 %v321_v36  ;;  %560 = vmatpush2.msra.mxu0 %v256_v37  ;;  %v38_v37 = vld [vmem:[%s974_s0 + $0x38] sm:$0x77] }
  0x41   :  { %631 = vmatpush2.msra.mxu1 %v320_v38  ;;  %561 = vmatprep.subr.mxu0 %v255_v39 }
  0x42   :  { %632 = vmatprep.subr.mxu1 %v319_v40  ;;  %562 = vmatpush2.msra.mxu0 %v254_v41 }
  0x43   :  { %633 = vmatpush2.msra.mxu1 %v318_v42  ;;  %563 = vmatprep.subr.mxu0 %v253_v43 }
  0x44   :  { %634 = vmatprep.subr.mxu1 %v317_v44  ;;  %564 = vmatpush2.msra.mxu0 %v252_v45 }
  0x45   :  { %635 = vmatpush2.msra.mxu1 %v316_v46  ;;  %565 = vmatprep.subr.mxu0 %v251_v47 }
  0x46   :  { %636 = vmatprep.subr.mxu1 %v315_v48  ;;  %566 = vmatpush2.msra.mxu0 %v250_v49 }
  0x47   :  { %637 = vmatpush2.msra.mxu1 %v314_v50  ;;  %567 = vmatprep.subr.mxu0 %v249_v51 }
  0x48   :  { %638 = vmatprep.subr.mxu1 %v313_v52  ;;  %568 = vmatpush2.msra.mxu0 %v248_v53 }
  0x49   :  { %639 = vmatpush2.msra.mxu1 %v312_v54  ;;  %569 = vmatprep.subr.mxu0 %v247_v55 }
  0x4a   :  { %640 = vmatprep.subr.mxu1 %v311_v56  ;;  %570 = vmatpush2.msra.mxu0 %v246_v57 }
  0x4b   :  { %641 = vmatpush2.msra.mxu1 %v310_v58  ;;  %571 = vmatprep.subr.mxu0 %v245_v59 }
  0x4c   :  { %642 = vmatprep.subr.mxu1 %v309_v60  ;;  %572 = vmatpush2.msra.mxu0 %v244_v61 }
  0x4d   :  { %643 = vmatpush2.msra.mxu1 %v308_v62  ;;  %573 = vmatprep.subr.mxu0 %v243_v63 }
  0x4e   :  { %644 = vmatprep.subr.mxu1 %v307_v0  ;;  %574 = vmatpush2.msra.mxu0 %v242_v1 }
  0x4f   :  { %645 = vmatpush2.msra.mxu1 %v306_v2  ;;  %653 = vmatprep.subr.mxu0 %v369_v3 }
  0x50   :  { %724 = vmatprep.subr.mxu1 %v433_v4 }
  0x8a   :  { %v44_v12 = vpop.permute.xlu0 %43 }
  0x8b   :  { %v55_v16 = vrot.slane %v44_v12, %v54_v10 }
  0x8d   :  { %v65_v17 = vmul.f32 %v55_v16, %v31_v11  ;;  %v66_v18 = vmul.f32 %v55_v16, %v32_v13  ;;  %v67_v19 = vmul.f32 %v55_v16, %v33_v14  ;;  %v893_v20 = vmul.f32 %v55_v16, %v34_v15 }
  0x8e   :  { %v48_v25 = vpop.permute.xlu0 %47 }
  0x8f   :  { %v81_v21 = vcombine.high %v65_v17, %v65_v17  ;;  %v82_v22 = vcombine.high %v66_v18, %v66_v18  ;;  %v83_v23 = vcombine.high %v67_v19, %v67_v19  ;;  %v84_v24 = vcombine.high %v893_v20, %v893_v20 }
  0x90   :  { %v98_v28 = vsel %vm97_vm0, %v65_v17, 0.0  ;;  %v112_v29 = vsel %vm97_vm0, %v66_v18, 0.0  ;;  %v126_v30 = vsel %vm97_vm0, %v67_v19, 0.0  ;;  %v140_v31 = vsel %vm97_vm0, %v893_v20, 0.0  ;;  %v432_v20 = vld [vmem:[#allocation2 + $0x6f0] sm:$0xff] }
  0x91   :  { %v99_v33 = vrot.slane %v98_v28, 4  ;;  %v113_v34 = vrot.slane %v112_v29, 4  ;;  %v127_v35 = vrot.slane %v126_v30, 4  ;;  %v141_v36 = vrot.slane %v140_v31, 4 }
  0x92   :  { %v62_v38 = vrot.slane %v48_v25, %v54_v10  ;;  %v105_v39 = vsel %vm97_vm0, %v81_v21, 0.0  ;;  %v119_v40 = vsel %vm97_vm0, %v82_v22, 0.0  ;;  %v917_v41 = vsel %vm97_vm0, %v83_v23, 0.0 }
  0x93   :  { %v919_v42 = vadd.f32 %v127_v35, %v126_v30  ;;  %v921_v43 = vadd.f32 %v141_v36, %v140_v31  ;;  %v106_v44 = vrot.slane %v105_v39, 4  ;;  %v120_v45 = vrot.slane %v119_v40, 4 }
  0x94   :  { %v69_v46 = vmul.f32 %v62_v38, %v35_v26  ;;  %v70_v47 = vmul.f32 %v62_v38, %v36_v27  ;;  %v71_v48 = vmul.f32 %v62_v38, %v37_v32  ;;  %v923_v49 = vmul.f32 %v62_v38, %v38_v37 }
  0x95   :  { %v107_v50 = vadd.f32 %v106_v44, %v105_v39  ;;  %v121_v51 = vadd.f32 %v120_v45, %v119_v40  ;;  %v100_v52 = vadd.f32 %v99_v33, %v98_v28  ;;  %v114_v53 = vadd.f32 %v113_v34, %v112_v29 }
  0x96   :  { %v85_v54 = vcombine.high %v69_v46, %v69_v46  ;;  %v86_v55 = vcombine.high %v70_v47, %v70_v47  ;;  %v87_v56 = vcombine.high %v71_v48, %v71_v48  ;;  %v88_v57 = vcombine.high %v923_v49, %v923_v49 }
  0x97   :  { %v154_v58 = vsel %vm97_vm0, %v69_v46, 0.0  ;;  %v168_v59 = vsel %vm97_vm0, %v70_v47, 0.0  ;;  %v182_v60 = vsel %vm97_vm0, %v71_v48, 0.0  ;;  %v196_v61 = vsel %vm97_vm0, %v923_v49, 0.0 }
  0x98   :  { %v155_v62 = vrot.slane %v154_v58, 4  ;;  %v169_v63 = vrot.slane %v168_v59, 4  ;;  %v183_v0 = vrot.slane %v182_v60, 4  ;;  %v197_v1 = vrot.slane %v196_v61, 4 }
  0x99   :  { %v108_v2 = vrot.slane %v107_v50, 2  ;;  %v161_v3 = vsel %vm97_vm0, %v85_v54, 0.0  ;;  %v122_v4 = vrot.slane %v121_v51, 2  ;;  %v175_v5 = vsel %vm97_vm0, %v86_v55, 0.0 }
  0x9a   :  { %v934_v6 = vadd.f32 %v183_v0, %v182_v60  ;;  %v936_v7 = vadd.f32 %v197_v1, %v196_v61  ;;  %v162_v8 = vrot.slane %v161_v3, 4  ;;  %v176_v9 = vrot.slane %v175_v5, 4 }
  0x9b   :  { %v109_v10 = vadd.f32 %v108_v2, %v107_v50  ;;  %v123_v11 = vadd.f32 %v122_v4, %v121_v51  ;;  %v101_v12 = vrot.slane %v100_v52, 2  ;;  %v156_v13 = vadd.f32 %v155_v62, %v154_v58  ;;  %v368_v62 = vld [vmem:[#allocation2 + $0x4f0] sm:$0xff]  ;;  %v431_v2 = vld [vmem:[#allocation2 + $0x6e8] sm:$0xff] }
  0x9c   :  { %v163_v14 = vadd.f32 %v162_v8, %v161_v3  ;;  %v177_v15 = vadd.f32 %v176_v9, %v175_v5  ;;  %v115_v16 = vrot.slane %v114_v53, 2  ;;  %v170_v17 = vadd.f32 %v169_v63, %v168_v59  ;;  %v366_v5 = vld [vmem:[#allocation2 + $0x4e0] sm:$0xff] }
  0x9d   :  { %v110_v18 = vrot.slane %v109_v10, 1  ;;  %v124_v19 = vrot.slane %v123_v11, 1  ;;  %v102_v21 = vadd.f32 %v101_v12, %v100_v52  ;;  %v157_v22 = vrot.slane %v156_v13, 2  ;;  %v430_v8 = vld [vmem:[#allocation2 + $0x6e0] sm:$0xff] }
  0x9e   :  { %v164_v23 = vrot.slane %v163_v14, 2  ;;  %v178_v25 = vrot.slane %v177_v15, 2  ;;  %v116_v26 = vadd.f32 %v115_v16, %v114_v53  ;;  %v171_v27 = vrot.slane %v170_v17, 2  ;;  %v429_v16 = vld [vmem:[#allocation2 + $0x6d8] sm:$0xff] }
  0x9f   :  { %v111_v28 = vadd.f32 %v110_v18, %v109_v10  ;;  %v125_v29 = vadd.f32 %v124_v19, %v123_v11  ;;  %v103_v30 = vrot.slane %v102_v21, 1  ;;  %v158_v31 = vadd.f32 %v157_v22, %v156_v13  ;;  %v364_v19 = vld [vmem:[#allocation2 + $0x4d0] sm:$0xff] }
  0xa0   :  { %v165_v32 = vadd.f32 %v164_v23, %v163_v14  ;;  %v179_v33 = vadd.f32 %v178_v25, %v177_v15  ;;  %v117_v34 = vrot.slane %v116_v26, 1  ;;  %v172_v35 = vadd.f32 %v171_v27, %v170_v17  ;;  %v365_v15 = vld [vmem:[#allocation2 + $0x4d8] sm:$0xff]  ;;  %v363_v27 = vld [vmem:[#allocation2 + $0x4c8] sm:$0xff] }
  0xa1   :  { %v104_v36 = vadd.f32 %v103_v30, %v102_v21  ;;  %v159_v37 = vrot.slane %v158_v31, 1  ;;  %v134_v38 = vrot.slane %v917_v41, 4  ;;  %v189_v39 = vsel %vm97_vm0, %v87_v56, 0.0  ;;  %v428_v21 = vld [vmem:[#allocation2 + $0x6d0] sm:$0xff]  ;;  %v362_v30 = vld [vmem:[#allocation2 + $0x4c0] sm:$0xff] }
  0xa2   :  { %v166_v40 = vrot.slane %v165_v32, 1  ;;  %v180_v44 = vrot.slane %v179_v33, 1  ;;  %v118_v45 = vadd.f32 %v117_v34, %v116_v26  ;;  %v173_v46 = vrot.slane %v172_v35, 1 }
  0xa3   :  { %v160_v47 = vadd.f32 %v159_v37, %v158_v31  ;;  %v135_v48 = vadd.f32 %v134_v38, %v917_v41  ;;  %v190_v49 = vrot.slane %v189_v39, 4  ;;  %v147_v50 = vsel %vm97_vm0, %v84_v24, 0.0  ;;  %v367_v24 = vld [vmem:[#allocation2 + $0x4e8] sm:$0xff]  ;;  %v425_v37 = vld [vmem:[#allocation2 + $0x6b8] sm:$0xff]  ;;  %v360_v38 = vld [vmem:[#allocation2 + $0x4b0] sm:$0xff] }
  0xa4   :  { %v167_v51 = vadd.f32 %v166_v40, %v165_v32  ;;  %v181_v52 = vadd.f32 %v180_v44, %v179_v33  ;;  %v174_v53 = vadd.f32 %v173_v46, %v172_v35  ;;  %v148_v54 = vrot.slane %v147_v50, 4 }
  0xa5   :  { %v484_v55 = vsel %vm483_vm1, %v160_v47, %v104_v36  ;;  %v136_v56 = vrot.slane %v135_v48, 2  ;;  %v191_v58 = vadd.f32 %v190_v49, %v189_v39  ;;  %v203_v59 = vsel %vm97_vm0, %v88_v57, 0.0  ;;  %v359_v47 = vld [vmem:[#allocation2 + $0x4a8] sm:$0xff]  ;;  %v358_v49 = vld [vmem:[#allocation2 + $0x4a0] sm:$0xff] }
  0xa6   :  { %v485_v60 = vsel %vm483_vm1, %v167_v51, %v111_v28  ;;  %v487_v41 = vsel %vm483_vm1, %v181_v52, %v125_v29  ;;  %v486_v61 = vsel %vm483_vm1, %v174_v53, %v118_v45  ;;  %v149_v63 = vadd.f32 %v148_v54, %v147_v50  ;;  %v427_v28 = vld [vmem:[#allocation2 + $0x6c8] sm:$0xff] }
  0xa7   :  { %575 = vmatprep.mubr.f32.mxu0 %v485_v60  ;;  %646 = vmatprep.mubr.f32.mxu1 %v487_v41  ;;  %v137_v0 = vadd.f32 %v136_v56, %v135_v48  ;;  %v192_v1 = vrot.slane %v191_v58, 2  ;;  %v204_v3 = vrot.slane %v203_v59, 4  ;;  %v129_v4 = vrot.slane %v919_v42, 2  ;;  %v423_v48 = vld [vmem:[#allocation2 + $0x6a8] sm:$0xff]  ;;  %v357_v56 = vld [vmem:[#allocation2 + $0x498] sm:$0xff]  ;;  %v356_v41 = vld [vmem:[#allocation2 + $0x490] sm:$0xff] }
  0xa8   :  { %576 = vmatmul.mubr.f32.vlgmr.msra.gmra.mxu0 %v484_v55  ;;  %647 = vmatmul.mubr.f32.vlgmr.msra.gmra.mxu1 %v486_v61  ;;  %v150_v57 = vrot.slane %v149_v63, 2  ;;  %v185_v9 = vrot.slane %v934_v6, 2  ;;  %v143_v10 = vrot.slane %v921_v43, 2  ;;  %v199_v11 = vrot.slane %v936_v7, 2  ;;  %v422_v55 = vld [vmem:[#allocation2 + $0x6a0] sm:$0xff]  ;;  %v420_v61 = vld [vmem:[#allocation2 + $0x690] sm:$0xff] }
  0xa9   :  { %654 = vmatpush1.msra.mxu0 %v368_v62  ;;  %725 = vmatpush1.msra.mxu1 %v432_v20  ;;  %v138_v12 = vrot.slane %v137_v0, 1  ;;  %v193_v13 = vadd.f32 %v192_v1, %v191_v58  ;;  %v205_v14 = vadd.f32 %v204_v3, %v203_v59  ;;  %v130_v17 = vadd.f32 %v129_v4, %v919_v42  ;;  %v426_v42 = vld [vmem:[#allocation2 + $0x6c0] sm:$0xff]  ;;  %v421_v58 = vld [vmem:[#allocation2 + $0x698] sm:$0xff]  ;;  %v355_v62 = vld [vmem:[#allocation2 + $0x488] sm:$0xff] }
  0xaa   :  { %655 = vmatprep.subr.mxu0 %v367_v24  ;;  %726 = vmatprep.subr.mxu1 %v431_v2  ;;  %v151_v18 = vadd.f32 %v150_v57, %v149_v63  ;;  %v186_v22 = vadd.f32 %v185_v9, %v934_v6  ;;  %v144_v23 = vadd.f32 %v143_v10, %v921_v43  ;;  %v361_v43 = vld [vmem:[#allocation2 + $0x4b8] sm:$0xff]  ;;  %v419_v20 = vld [vmem:[#allocation2 + $0x688] sm:$0xff]  ;;  %v354_v63 = vld [vmem:[#allocation2 + $0x480] sm:$0xff] }
  0xab   :  { %v194_v25 = vrot.slane %v193_v13, 1  ;;  %v206_v26 = vrot.slane %v205_v14, 2  ;;  %656 = vmatpush1.msra.mxu0 %v366_v5  ;;  %727 = vmatpush1.msra.mxu1 %v430_v8  ;;  %v131_v29 = vrot.slane %v130_v17, 1  ;;  %v200_v33 = vadd.f32 %v199_v11, %v936_v7  ;;  %v424_v7 = vld [vmem:[#allocation2 + $0x6b0] sm:$0xff]  ;;  %v418_v24 = vld [vmem:[#allocation2 + $0x680] sm:$0xff]  ;;  %v417_v1 = vld [vmem:[#allocation2 + $0x678] sm:$0xff] }
  0xac   :  { %657 = vmatprep.subr.mxu0 %v365_v15  ;;  %728 = vmatprep.subr.mxu1 %v429_v16  ;;  %v187_v31 = vrot.slane %v186_v22, 1  ;;  %v145_v32 = vrot.slane %v144_v23, 1  ;;  %v139_v34 = vadd.f32 %v138_v12, %v137_v0  ;;  %v152_v6 = vrot.slane %v151_v18, 1  ;;  %v353_v0 = vld [vmem:[#allocation2 + $0x478] sm:$0xff]  ;;  %v352_v2 = vld [vmem:[#allocation2 + $0x470] sm:$0xff]  ;;  %v351_v4 = vld [vmem:[#allocation2 + $0x468] sm:$0xff] }
  0xad   :  { %v195_v35 = vadd.f32 %v194_v25, %v193_v13  ;;  %v207_v36 = vadd.f32 %v206_v26, %v205_v14  ;;  %658 = vmatpush1.msra.mxu0 %v364_v19  ;;  %729 = vmatpush1.msra.mxu1 %v428_v21  ;;  %v132_v39 = vadd.f32 %v131_v29, %v130_v17  ;;  %v201_v44 = vrot.slane %v200_v33, 1  ;;  %v416_v3 = vld [vmem:[#allocation2 + $0x670] sm:$0xff]  ;;  %v415_v57 = vld [vmem:[#allocation2 + $0x668] sm:$0xff]  ;;  %v350_v5 = vld [vmem:[#allocation2 + $0x460] sm:$0xff] }
  0xae   :  { %659 = vmatprep.subr.mxu0 %v363_v27  ;;  %730 = vmatprep.subr.mxu1 %v427_v28  ;;  %v188_v40 = vadd.f32 %v187_v31, %v186_v22  ;;  %v146_v51 = vadd.f32 %v145_v32, %v144_v23  ;;  %v153_v53 = vadd.f32 %v152_v6, %v151_v18  ;;  %v414_v8 = vld [vmem:[#allocation2 + $0x660] sm:$0xff]  ;;  %v349_v9 = vld [vmem:[#allocation2 + $0x458] sm:$0xff]  ;;  %v348_v11 = vld [vmem:[#allocation2 + $0x450] sm:$0xff] }
  0xaf   :  { %v489_v45 = vsel %vm483_vm1, %v195_v35, %v139_v34  ;;  %v208_v46 = vrot.slane %v207_v36, 1  ;;  %660 = vmatpush1.msra.mxu0 %v362_v30  ;;  %731 = vmatpush1.msra.mxu1 %v426_v42  ;;  %v202_v52 = vadd.f32 %v201_v44, %v200_v33  ;;  %v413_v10 = vld [vmem:[#allocation2 + $0x658] sm:$0xff]  ;;  %v412_v12 = vld [vmem:[#allocation2 + $0x650] sm:$0xff]  ;;  %v347_v13 = vld [vmem:[#allocation2 + $0x448] sm:$0xff] }
  0xb0   :  { %717 = vmatprep.mubr.f32.mxu0 %v489_v45  ;;  %661 = vmatprep.subr.mxu0 %v361_v43  ;;  %v960_v50 = vsel %vm483_vm1, %v188_v40, %v132_v39  ;;  %v411_v14 = vld [vmem:[#allocation2 + $0x648] sm:$0xff]  ;;  %v346_v15 = vld [vmem:[#allocation2 + $0x440] sm:$0xff]  ;;  %v345_v17 = vld [vmem:[#allocation2 + $0x438] sm:$0xff] }
  0xb1   :  { %v209_v54 = vadd.f32 %v208_v46, %v207_v36  ;;  %732 = vmatprep.subr.mxu1 %v425_v37  ;;  %662 = vmatpush1.msra.mxu0 %v360_v38  ;;  %v963_v59 = vsel %vm483_vm1, %v202_v52, %v146_v51  ;;  %v410_v16 = vld [vmem:[#allocation2 + $0x640] sm:$0xff]  ;;  %v409_v18 = vld [vmem:[#allocation2 + $0x638] sm:$0xff]  ;;  %v344_v19 = vld [vmem:[#allocation2 + $0x430] sm:$0xff] }
  0xb2   :  { %733 = vmatpush1.msra.mxu1 %v424_v7  ;;  %663 = vmatprep.subr.mxu0 %v359_v47  ;;  %v408_v21 = vld [vmem:[#allocation2 + $0x630] sm:$0xff]  ;;  %v343_v22 = vld [vmem:[#allocation2 + $0x428] sm:$0xff]  ;;  %v342_v25 = vld [vmem:[#allocation2 + $0x420] sm:$0xff] }
  0xb3   :  { %v491_v60 = vsel %vm483_vm1, %v209_v54, %v153_v53  ;;  %734 = vmatprep.subr.mxu1 %v423_v48  ;;  %664 = vmatpush1.msra.mxu0 %v358_v49  ;;  %v407_v23 = vld [vmem:[#allocation2 + $0x628] sm:$0xff]  ;;  %v406_v26 = vld [vmem:[#allocation2 + $0x620] sm:$0xff]  ;;  %v341_v27 = vld [vmem:[#allocation2 + $0x418] sm:$0xff] }
  0xb4   :  { %788 = vmatprep.mubr.f32.mxu1 %v491_v60  ;;  %735 = vmatpush1.msra.mxu1 %v422_v55  ;;  %v405_v28 = vld [vmem:[#allocation2 + $0x618] sm:$0xff]  ;;  %v340_v29 = vld [vmem:[#allocation2 + $0x410] sm:$0xff]  ;;  %v339_v42 = vld [vmem:[#allocation2 + $0x408] sm:$0xff] }
  0xb5   :  { %665 = vmatprep.subr.mxu0 %v357_v56  ;;  %736 = vmatprep.subr.mxu1 %v421_v58  ;;  %v404_v30 = vld [vmem:[#allocation2 + $0x610] sm:$0xff]  ;;  %v403_v31 = vld [vmem:[#allocation2 + $0x608] sm:$0xff]  ;;  %v338_v32 = vld [vmem:[#allocation2 + $0x400] sm:$0xff] }
  0xb6   :  { %666 = vmatpush1.msra.mxu0 %v356_v41  ;;  %737 = vmatpush1.msra.mxu1 %v420_v61  ;;  %v402_v33 = vld [vmem:[#allocation2 + $0x600] sm:$0xff]  ;;  %v401_v34 = vld [vmem:[#allocation2 + $0x5f8] sm:$0xff]  ;;  %v400_v6 = vld [vmem:[#allocation2 + $0x5f0] sm:$0xff] }
  0xb7   :  { %667 = vmatprep.subr.mxu0 %v355_v62  ;;  %738 = vmatprep.subr.mxu1 %v419_v20  ;;  %v465_v35 = vld [vmem:[#allocation2 + $0x7f8] sm:$0xff]  ;;  %v464_v36 = vld [vmem:[#allocation2 + $0x7f0] sm:$0xff]  ;;  %v399_v43 = vld [vmem:[#allocation2 + $0x5e8] sm:$0xff] }
  0xb8   :  { %668 = vmatpush1.msra.mxu0 %v354_v63  ;;  %739 = vmatpush1.msra.mxu1 %v418_v24  ;;  %v463_v37 = vld [vmem:[#allocation2 + $0x7e8] sm:$0xff]  ;;  %v398_v38 = vld [vmem:[#allocation2 + $0x5e0] sm:$0xff]  ;;  %v397_v40 = vld [vmem:[#allocation2 + $0x5d8] sm:$0xff] }
  0xb9   :  { %669 = vmatprep.subr.mxu0 %v353_v0  ;;  %740 = vmatprep.subr.mxu1 %v417_v1  ;;  %v462_v39 = vld [vmem:[#allocation2 + $0x7e0] sm:$0xff]  ;;  %v461_v44 = vld [vmem:[#allocation2 + $0x7d8] sm:$0xff]  ;;  %v396_v45 = vld [vmem:[#allocation2 + $0x5d0] sm:$0xff] }
  0xba   :  { %670 = vmatpush1.msra.mxu0 %v352_v2  ;;  %741 = vmatpush1.msra.mxu1 %v416_v3  ;;  %v460_v46 = vld [vmem:[#allocation2 + $0x7d0] sm:$0xff]  ;;  %v395_v7 = vld [vmem:[#allocation2 + $0x5c8] sm:$0xff]  ;;  %v394_v48 = vld [vmem:[#allocation2 + $0x5c0] sm:$0xff] }
  0xbb   :  { %671 = vmatprep.subr.mxu0 %v351_v4  ;;  %742 = vmatprep.subr.mxu1 %v415_v57  ;;  %v459_v47 = vld [vmem:[#allocation2 + $0x7c8] sm:$0xff]  ;;  %v458_v49 = vld [vmem:[#allocation2 + $0x7c0] sm:$0xff]  ;;  %v393_v51 = vld [vmem:[#allocation2 + $0x5b8] sm:$0xff] }
  0xbc   :  { %672 = vmatpush1.msra.mxu0 %v350_v5  ;;  %743 = vmatpush1.msra.mxu1 %v414_v8  ;;  %v457_v52 = vld [vmem:[#allocation2 + $0x7b8] sm:$0xff]  ;;  %v392_v53 = vld [vmem:[#allocation2 + $0x5b0] sm:$0xff]  ;;  %v391_v55 = vld [vmem:[#allocation2 + $0x5a8] sm:$0xff] }
  0xbd   :  { %673 = vmatprep.subr.mxu0 %v349_v9  ;;  %744 = vmatprep.subr.mxu1 %v413_v10  ;;  %v456_v54 = vld [vmem:[#allocation2 + $0x7b0] sm:$0xff]  ;;  %v455_v56 = vld [vmem:[#allocation2 + $0x7a8] sm:$0xff]  ;;  %v390_v58 = vld [vmem:[#allocation2 + $0x5a0] sm:$0xff] }
  0xbe   :  { %674 = vmatpush1.msra.mxu0 %v348_v11  ;;  %745 = vmatpush1.msra.mxu1 %v412_v12  ;;  %v454_v60 = vld [vmem:[#allocation2 + $0x7a0] sm:$0xff]  ;;  %v389_v41 = vld [vmem:[#allocation2 + $0x598] sm:$0xff]  ;;  %v388_v62 = vld [vmem:[#allocation2 + $0x590] sm:$0xff] }
  0xbf   :  { %675 = vmatprep.subr.mxu0 %v347_v13  ;;  %746 = vmatprep.subr.mxu1 %v411_v14  ;;  %v453_v61 = vld [vmem:[#allocation2 + $0x798] sm:$0xff]  ;;  %v452_v20 = vld [vmem:[#allocation2 + $0x790] sm:$0xff]  ;;  %v387_v63 = vld [vmem:[#allocation2 + $0x588] sm:$0xff] }
  0xc0   :  { %676 = vmatpush1.msra.mxu0 %v346_v15  ;;  %747 = vmatpush1.msra.mxu1 %v410_v16  ;;  %v451_v24 = vld [vmem:[#allocation2 + $0x788] sm:$0xff]  ;;  %v386_v0 = vld [vmem:[#allocation2 + $0x580] sm:$0xff]  ;;  %v385_v2 = vld [vmem:[#allocation2 + $0x578] sm:$0xff] }
  0xc1   :  { %677 = vmatprep.subr.mxu0 %v345_v17  ;;  %748 = vmatprep.subr.mxu1 %v409_v18  ;;  %v450_v1 = vld [vmem:[#allocation2 + $0x780] sm:$0xff]  ;;  %v449_v3 = vld [vmem:[#allocation2 + $0x778] sm:$0xff]  ;;  %v384_v4 = vld [vmem:[#allocation2 + $0x570] sm:$0xff] }
  0xc2   :  { %678 = vmatpush1.msra.mxu0 %v344_v19  ;;  %749 = vmatpush1.msra.mxu1 %v408_v21  ;;  %v448_v57 = vld [vmem:[#allocation2 + $0x770] sm:$0xff]  ;;  %v383_v5 = vld [vmem:[#allocation2 + $0x568] sm:$0xff]  ;;  %v382_v9 = vld [vmem:[#allocation2 + $0x560] sm:$0xff] }
  0xc3   :  { %679 = vmatprep.subr.mxu0 %v343_v22  ;;  %750 = vmatprep.subr.mxu1 %v407_v23  ;;  %v447_v8 = vld [vmem:[#allocation2 + $0x768] sm:$0xff]  ;;  %v446_v10 = vld [vmem:[#allocation2 + $0x760] sm:$0xff]  ;;  %v381_v11 = vld [vmem:[#allocation2 + $0x558] sm:$0xff] }
  0xc4   :  { %680 = vmatpush1.msra.mxu0 %v342_v25  ;;  %751 = vmatpush1.msra.mxu1 %v406_v26  ;;  %v445_v12 = vld [vmem:[#allocation2 + $0x758] sm:$0xff]  ;;  %v380_v13 = vld [vmem:[#allocation2 + $0x550] sm:$0xff]  ;;  %v379_v15 = vld [vmem:[#allocation2 + $0x548] sm:$0xff] }
  0xc5   :  { %681 = vmatprep.subr.mxu0 %v341_v27  ;;  %752 = vmatprep.subr.mxu1 %v405_v28  ;;  %v444_v14 = vld [vmem:[#allocation2 + $0x750] sm:$0xff]  ;;  %v443_v16 = vld [vmem:[#allocation2 + $0x748] sm:$0xff]  ;;  %v378_v17 = vld [vmem:[#allocation2 + $0x540] sm:$0xff] }
  0xc6   :  { %682 = vmatpush1.msra.mxu0 %v340_v29  ;;  %753 = vmatpush1.msra.mxu1 %v404_v30  ;;  %v442_v18 = vld [vmem:[#allocation2 + $0x740] sm:$0xff]  ;;  %v377_v19 = vld [vmem:[#allocation2 + $0x538] sm:$0xff]  ;;  %v376_v22 = vld [vmem:[#allocation2 + $0x530] sm:$0xff] }
  0xc7   :  { %683 = vmatprep.subr.mxu0 %v339_v42  ;;  %754 = vmatprep.subr.mxu1 %v403_v31  ;;  %v441_v21 = vld [vmem:[#allocation2 + $0x738] sm:$0xff]  ;;  %v440_v23 = vld [vmem:[#allocation2 + $0x730] sm:$0xff]  ;;  %v375_v25 = vld [vmem:[#allocation2 + $0x528] sm:$0xff] }
  0xc8   :  { %684 = vmatpush1.msra.mxu0 %v338_v32  ;;  %755 = vmatpush1.msra.mxu1 %v402_v33  ;;  %v439_v26 = vld [vmem:[#allocation2 + $0x728] sm:$0xff]  ;;  %v374_v27 = vld [vmem:[#allocation2 + $0x520] sm:$0xff]  ;;  %v373_v29 = vld [vmem:[#allocation2 + $0x518] sm:$0xff] }
  0xc9   :  { %685 = vmatprep.subr.mxu0 %v401_v34  ;;  %756 = vmatprep.subr.mxu1 %v465_v35  ;;  %v438_v28 = vld [vmem:[#allocation2 + $0x720] sm:$0xff]  ;;  %v437_v30 = vld [vmem:[#allocation2 + $0x718] sm:$0xff]  ;;  %v372_v42 = vld [vmem:[#allocation2 + $0x510] sm:$0xff] }
  0xca   :  { %686 = vmatpush2.msra.mxu0 %v400_v6  ;;  %757 = vmatpush2.msra.mxu1 %v464_v36  ;;  %v436_v31 = vld [vmem:[#allocation2 + $0x710] sm:$0xff]  ;;  %v371_v32 = vld [vmem:[#allocation2 + $0x508] sm:$0xff]  ;;  %v370_v34 = vld [vmem:[#allocation2 + $0x500] sm:$0xff] }
  0xcb   :  { %687 = vmatprep.subr.mxu0 %v399_v43  ;;  %758 = vmatprep.subr.mxu1 %v463_v37  ;;  %v435_v33 = vld [vmem:[#allocation2 + $0x708] sm:$0xff]  ;;  %v434_v35 = vld [vmem:[#allocation2 + $0x700] sm:$0xff] }
  0xcc   :  { %688 = vmatpush2.msra.mxu0 %v398_v38  ;;  %759 = vmatpush2.msra.mxu1 %v462_v39  ;;  %v812_v6 = vld.sshfl [vmem:[%s977_s3] sm:$0x33 pattern:$0x76325410] }
  0xcd   :  { %689 = vmatprep.subr.mxu0 %v397_v40  ;;  %760 = vmatprep.subr.mxu1 %v461_v44  ;;  %v508_v43 = vcombine.high %v812_v6, %v812_v6 }
  0xce   :  { %690 = vmatpush2.msra.mxu0 %v396_v45  ;;  %761 = vmatpush2.msra.mxu1 %v460_v46 }
  0xcf   :  { %691 = vmatprep.subr.mxu0 %v395_v7  ;;  %762 = vmatprep.subr.mxu1 %v459_v47 }
  0xd0   :  { %692 = vmatpush2.msra.mxu0 %v394_v48  ;;  %763 = vmatpush2.msra.mxu1 %v458_v49 }
  0xd1   :  { %693 = vmatprep.subr.mxu0 %v393_v51  ;;  %764 = vmatprep.subr.mxu1 %v457_v52 }
  0xd2   :  { %694 = vmatpush2.msra.mxu0 %v392_v53  ;;  %765 = vmatpush2.msra.mxu1 %v456_v54 }
  0xd3   :  { %695 = vmatprep.subr.mxu0 %v391_v55  ;;  %766 = vmatprep.subr.mxu1 %v455_v56 }
  0xd4   :  { %696 = vmatpush2.msra.mxu0 %v390_v58  ;;  %767 = vmatpush2.msra.mxu1 %v454_v60 }
  0xd5   :  { %697 = vmatprep.subr.mxu0 %v389_v41  ;;  %768 = vmatprep.subr.mxu1 %v453_v61 }
  0xd6   :  { %698 = vmatpush2.msra.mxu0 %v388_v62  ;;  %769 = vmatpush2.msra.mxu1 %v452_v20 }
  0xd7   :  { %699 = vmatprep.subr.mxu0 %v387_v63  ;;  %770 = vmatprep.subr.mxu1 %v451_v24 }
  0xd8   :  { %700 = vmatpush2.msra.mxu0 %v386_v0  ;;  %771 = vmatpush2.msra.mxu1 %v450_v1 }
  0xd9   :  { %701 = vmatprep.subr.mxu0 %v385_v2  ;;  %772 = vmatprep.subr.mxu1 %v449_v3 }
  0xda   :  { %702 = vmatpush2.msra.mxu0 %v384_v4  ;;  %773 = vmatpush2.msra.mxu1 %v448_v57 }
  0xdb   :  { %703 = vmatprep.subr.mxu0 %v383_v5  ;;  %774 = vmatprep.subr.mxu1 %v447_v8 }
  0xdc   :  { %704 = vmatpush2.msra.mxu0 %v382_v9  ;;  %775 = vmatpush2.msra.mxu1 %v446_v10 }
  0xdd   :  { %705 = vmatprep.subr.mxu0 %v381_v11  ;;  %776 = vmatprep.subr.mxu1 %v445_v12 }
  0xde   :  { %706 = vmatpush2.msra.mxu0 %v380_v13  ;;  %777 = vmatpush2.msra.mxu1 %v444_v14 }
  0xdf   :  { %707 = vmatprep.subr.mxu0 %v379_v15  ;;  %778 = vmatprep.subr.mxu1 %v443_v16 }
  0xe0   :  { %708 = vmatpush2.msra.mxu0 %v378_v17  ;;  %779 = vmatpush2.msra.mxu1 %v442_v18 }
  0xe1   :  { %709 = vmatprep.subr.mxu0 %v377_v19  ;;  %780 = vmatprep.subr.mxu1 %v441_v21 }
  0xe2   :  { %710 = vmatpush2.msra.mxu0 %v376_v22  ;;  %781 = vmatpush2.msra.mxu1 %v440_v23 }
  0xe3   :  { %711 = vmatprep.subr.mxu0 %v375_v25  ;;  %782 = vmatprep.subr.mxu1 %v439_v26 }
  0xe4   :  { %712 = vmatpush2.msra.mxu0 %v374_v27  ;;  %783 = vmatpush2.msra.mxu1 %v438_v28 }
  0xe5   :  { %713 = vmatprep.subr.mxu0 %v373_v29  ;;  %784 = vmatprep.subr.mxu1 %v437_v30 }
  0xe6   :  { %714 = vmatpush2.msra.mxu0 %v372_v42  ;;  %785 = vmatpush2.msra.mxu1 %v436_v31 }
  0xe7   :  { %715 = vmatprep.subr.mxu0 %v371_v32  ;;  %786 = vmatprep.subr.mxu1 %v435_v33 }
  0xe8   :  { %716 = vmatpush2.msra.mxu0 %v370_v34  ;;  %787 = vmatpush2.msra.mxu1 %v434_v35 }
  0xe9   :  { %718 = vmatmul.mubr.f32.vlgmr.msra.gmra.mxu0 %v960_v50  ;;  %789 = vmatmul.mubr.f32.vlgmr.msra.gmra.mxu1 %v963_v59 }
 0x168   :  { %v577_v36 = vpop.f32.mrf.mxu0  ;;  %v648_v37 = vpop.f32.mrf.mxu1 }
 0x169   :  { %v578_v39 = vadd.f32 %v812_v6, %v577_v36 }
 0x16a   :  { %v579_v38 = vpop.f32.mrf.mxu0  ;;  %v650_v44 = vpop.f32.mrf.mxu1 }
 0x16b   :  { %v580_v40 = vadd.f32 %v579_v38, %v508_v43  ;;  %v649_v45 = vadd.f32 %v648_v37, %v578_v39 }
 0x16d   :  { %v651_v47 = vadd.f32 %v650_v44, %v580_v40 }
 0x1a9   :  { %v719_v46 = vpop.f32.mrf.mxu0  ;;  %v790_v7 = vpop.f32.mrf.mxu1 }
 0x1aa   :  { %v720_v48 = vadd.f32 %v719_v46, %v649_v45 }
 0x1ab   :  { %v721_v49 = vpop.f32.mrf.mxu0  ;;  %v792_v51 = vpop.f32.mrf.mxu1 }
 0x1ac   :  { %v722_v50 = vadd.f32 %v721_v49, %v651_v47  ;;  %v791_v59 = vadd.f32 %v790_v7, %v720_v48 }
 0x1ae   :  { %v793_v52 = vadd.f32 %v792_v51, %v722_v50 }
 0x1b0   :  { %v797_v53 = vcombine.low %v791_v59, %v793_v52 }
 0x1b2   :  { %813 = vst.sshfl [vmem:[%s978_s4] sm:$0x33 pattern:$0x76325410] %v797_v53 }
 0x1b3   :  { %811 = vsyncpa [#allocation3], 1 }

</bundles_post_ra>
